<compile_context>
chip_gen: v7x
topology: tpu7x:2x2x1
jax: 0.10.0
libtpu: 0.0.40
codegen_flags: <defaults>
</compile_context>

<pallas_src>
import jax
import jax.numpy as jnp
from jax import lax
from jax.experimental import pallas as pl
from jax.experimental.pallas import tpu as pltpu


def _round_up(x: int, m: int) -> int:
    return ((x + m - 1) // m) * m


def _masked_logit_kernel(xo_ref, xh_ref, valid_ref, out_ref):
    # xo_ref:    [1, TN, D]  bf16 pre-projected object tile (batch b, obj tile i)
    # xh_ref:    [1, TM, D]  bf16 pre-projected hit tile    (batch b, hit tile j)
    # valid_ref: [1, 1, TM]  int32 hit-validity mask        (batch b, hit tile j)
    # out_ref:   [1, TN, TM] masked object-hit logits
    # logit[n, m] = sum_d xo[n, d] * xh[m, d]  (contract last dims of both).
    logit = lax.dot_general(
        xo_ref[0], xh_ref[0],
        dimension_numbers=(((1,), (1,)), ((), ())),
        preferred_element_type=jnp.float32)                       # [TN, TM] f32

    valid = valid_ref[0] != 0                                     # [1, TM]
    neg = jnp.finfo(out_ref.dtype).min
    out_ref[0] = jnp.where(valid, logit, neg).astype(out_ref.dtype)


def object_hit_mask_forward(object_embed, hit_embed, hit_valid,
                            object_w, object_b, hit_w, hit_b,
                            *, output_object="track", input_hit="hit",
                            out_dtype=None):
    """Pallas implementation of ObjectHitMaskTask.forward.

    object_embed: [B, N, D]   query/object embeddings
    hit_embed:    [B, M, D]   hit embeddings
    hit_valid:    [B, M]      bool hit-validity mask
    object_w/b:   [D, D] / [D]   object_net = Dense(dim, dim), y = x @ W + b
    hit_w/b:      [D, D] / [D]   hit_net    = Dense(dim, dim)
    returns: {f"{output_object}_{input_hit}_logit": [B, N, M]}
    """
    B, N, D = object_embed.shape
    Bh, M, Dh = hit_embed.shape
    assert (Bh, Dh) == (B, D)
    if out_dtype is None:
        out_dtype = object_embed.dtype
    bf16 = jnp.bfloat16

    # --- Projections hoisted to XLA (bf16 feed, f32 accumulate + bias). -----
    xo = jnp.einsum("bnd,de->bne", object_embed.astype(bf16),
                    object_w.astype(bf16),
                    preferred_element_type=jnp.float32) + object_b.astype(jnp.float32)
    xh = jnp.einsum("bmd,de->bme", hit_embed.astype(bf16),
                    hit_w.astype(bf16),
                    preferred_element_type=jnp.float32) + hit_b.astype(jnp.float32)
    xo = xo.astype(bf16)                                           # [B, N, D]
    xh = xh.astype(bf16)                                           # [B, M, D]
    valid = hit_valid.astype(jnp.int32)[:, None, :]                # [B, 1, M]

    # --- Tile sizes: lane-dense hit axis, MXU-sized object axis. ------------
    TN = min(256, _round_up(N, 8))
    TM = min(1024, _round_up(M, 128))
    grid = (B, pl.cdiv(M, TM), pl.cdiv(N, TN))   # object tiles innermost

    out_itemsize = jnp.dtype(out_dtype).itemsize
    flops = 2 * B * N * M * D
    bytes_io = (B * N * D + B * M * D) * 2 + B * M * 4 + B * N * M * out_itemsize

    logits = pl.pallas_call(
        _masked_logit_kernel,
        out_shape=jax.ShapeDtypeStruct((B, N, M), out_dtype),
        grid=grid,
        in_specs=[
            pl.BlockSpec((1, TN, D), lambda b, j, i: (b, i, 0)),   # object tile
            pl.BlockSpec((1, TM, D), lambda b, j, i: (b, j, 0)),   # hit tile
            pl.BlockSpec((1, 1, TM), lambda b, j, i: (b, 0, j)),   # hit validity
        ],
        out_specs=pl.BlockSpec((1, TN, TM), lambda b, j, i: (b, i, j)),
        compiler_params=pltpu.CompilerParams(
            dimension_semantics=("parallel", "parallel", "parallel")),
        cost_estimate=pl.CostEstimate(
            flops=int(flops), transcendentals=0, bytes_accessed=int(bytes_io)),
    )(xo, xh, valid)

    return {f"{output_object}_{input_hit}_logit": logits}


if __name__ == "__main__":
    # Small shapes consistent with the module:
    #   x["query_embed"]: [batch, num_objects, dim]
    #   x["hit_embed"]:   [batch, num_hits, dim]
    #   x["hit_valid"]:   [batch, num_hits] (bool)
    batch, num_objects, num_hits, dim = 2, 8, 16, 32

    key = jax.random.PRNGKey(0)
    k_obj, k_hit, k_wo, k_bo, k_wh, k_bh, k_valid = jax.random.split(key, 7)

    object_embed = jax.random.normal(k_obj, (batch, num_objects, dim), jnp.float32)
    hit_embed = jax.random.normal(k_hit, (batch, num_hits, dim), jnp.float32)
    hit_valid = jax.random.bernoulli(k_valid, 0.75, (batch, num_hits))

    # Deterministic torch.nn.Linear-style init: U(-1/sqrt(dim), 1/sqrt(dim))
    bound = 1.0 / (dim ** 0.5)
    object_w = jax.random.uniform(k_wo, (dim, dim), jnp.float32, -bound, bound)
    object_b = jax.random.uniform(k_bo, (dim,), jnp.float32, -bound, bound)
    hit_w = jax.random.uniform(k_wh, (dim, dim), jnp.float32, -bound, bound)
    hit_b = jax.random.uniform(k_bh, (dim,), jnp.float32, -bound, bound)

    out = object_hit_mask_forward(object_embed, hit_embed, hit_valid,
                                  object_w, object_b, hit_w, hit_b,
                                  output_object="track", input_hit="hit")
    logits = out["track_hit_logit"]
    jax.block_until_ready(logits)
    assert logits.shape == (batch, num_objects, num_hits)
    assert logits.dtype == object_embed.dtype

    # Plain-JAX reference mirroring the bf16-feed / f32-accumulate math.
    bf16 = jnp.bfloat16
    xo_ref = (jnp.einsum("bnd,de->bne", object_embed.astype(bf16),
                         object_w.astype(bf16),
                         preferred_element_type=jnp.float32) + object_b).astype(bf16)
    xh_ref = (jnp.einsum("bmd,de->bme", hit_embed.astype(bf16),
                         hit_w.astype(bf16),
                         preferred_element_type=jnp.float32) + hit_b).astype(bf16)
    ref = jnp.einsum("bnc,bmc->bnm", xo_ref, xh_ref,
                     preferred_element_type=jnp.float32)
    ref = jnp.where(hit_valid[:, None, :], ref, jnp.finfo(jnp.float32).min)

    assert jnp.allclose(logits, ref, atol=1e-2, rtol=1e-2)
    print("KERNEL_OK")
</pallas_src>

<mosaic_0001>
module attributes {stable_mosaic.version = 11 : i64} {
  func.func @_masked_logit_kernel(%arg0: i32, %arg1: i32, %arg2: i32, %arg3: memref<1x8x32xbf16, #tpu.memory_space<vmem>>, %arg4: memref<1x128x32xbf16, #tpu.memory_space<vmem>>, %arg5: memref<1x1x128xi32, #tpu.memory_space<vmem>>, %arg6: memref<1x8x128xf32, #tpu.memory_space<vmem>>) attributes {dimension_semantics = [#tpu.dimension_semantics<parallel>, #tpu.dimension_semantics<parallel>, #tpu.dimension_semantics<parallel>], iteration_bounds = array<i64: 2, 1, 1>, scalar_prefetch = 0 : i64, scratch_operands = 0 : i64, tpu.core_type = #tpu.core_type<tc>, window_params = [{transform_indices = @transform_0, window_bounds = array<i64: 1, 8, 32>}, {transform_indices = @transform_1, window_bounds = array<i64: 1, 128, 32>}, {transform_indices = @transform_2, window_bounds = array<i64: 1, 1, 128>}, {transform_indices = @transform_3, window_bounds = array<i64: 1, 8, 128>}]} {
    %c0 = arith.constant 0 : index
    %c0_0 = arith.constant 0 : index
    %c0_1 = arith.constant 0 : index
    %0 = vector.load %arg3[%c0, %c0_0, %c0_1] : memref<1x8x32xbf16, #tpu.memory_space<vmem>>, vector<1x8x32xbf16>
    %1 = vector.shape_cast %0 : vector<1x8x32xbf16> to vector<8x32xbf16>
    %c0_2 = arith.constant 0 : index
    %c0_3 = arith.constant 0 : index
    %c0_4 = arith.constant 0 : index
    %2 = vector.load %arg4[%c0_2, %c0_3, %c0_4] : memref<1x128x32xbf16, #tpu.memory_space<vmem>>, vector<1x128x32xbf16>
    %3 = vector.shape_cast %2 : vector<1x128x32xbf16> to vector<128x32xbf16>
    %cst = arith.constant dense<0.000000e+00> : vector<8x128xf32>
    %4 = tpu.matmul %1, %3, %cst {dimension_numbers = #tpu.dot_dimension_numbers<[1], [1], [0], [0], [0, 0, 1, 0], [], []>} : vector<8x32xbf16>, vector<128x32xbf16>, vector<8x128xf32> -> vector<8x128xf32>
    %c0_5 = arith.constant 0 : index
    %c0_6 = arith.constant 0 : index
    %c0_7 = arith.constant 0 : index
    %5 = vector.load %arg5[%c0_5, %c0_6, %c0_7] : memref<1x1x128xi32, #tpu.memory_space<vmem>>, vector<1x1x128xi32>
    %6 = vector.shape_cast %5 : vector<1x1x128xi32> to vector<1x128xi32>
    %c0_i32 = arith.constant 0 : i32
    %7 = vector.broadcast %c0_i32 : i32 to vector<1x128xi32>
    %8 = arith.cmpi ne, %6, %7 : vector<1x128xi32>
    %cst_8 = arith.constant -3.40282347E+38 : f32
    %9 = vector.shape_cast %8 : vector<1x128xi1> to vector<1x128xi1>
    %10 = vector.broadcast %9 : vector<1x128xi1> to vector<8x128xi1>
    %11 = vector.broadcast %cst_8 : f32 to vector<8x128xf32>
    %12 = arith.select %10, %4, %11 : vector<8x128xi1>, vector<8x128xf32>
    %c0_9 = arith.constant 0 : index
    %c0_10 = arith.constant 0 : index
    %c0_11 = arith.constant 0 : index
    %13 = vector.load %arg6[%c0_9, %c0_10, %c0_11] : memref<1x8x128xf32, #tpu.memory_space<vmem>>, vector<1x8x128xf32>
    %14 = vector.shape_cast %13 : vector<1x8x128xf32> to vector<8x128xf32>
    %15 = vector.shape_cast %12 : vector<8x128xf32> to vector<1x8x128xf32>
    tpu.vector_store %arg6[%c0_9, %c0_10, %c0_11], %15 {strides = array<i32>} : memref<1x8x128xf32, #tpu.memory_space<vmem>>, vector<1x8x128xf32>,
    return
  }
  func.func @transform_0(%arg0: i32, %arg1: i32, %arg2: i32) -> (i32, i32, i32) {
    %c0_i32 = arith.constant 0 : i32
    %c0_i32_0 = arith.constant 0 : i32
    return %arg0, %arg2, %c0_i32 : i32, i32, i32
  }
  func.func @transform_1(%arg0: i32, %arg1: i32, %arg2: i32) -> (i32, i32, i32) {
    %c0_i32 = arith.constant 0 : i32
    %c0_i32_0 = arith.constant 0 : i32
    return %arg0, %arg1, %c0_i32 : i32, i32, i32
  }
  func.func @transform_2(%arg0: i32, %arg1: i32, %arg2: i32) -> (i32, i32, i32) {
    %c0_i32 = arith.constant 0 : i32
    %c0_i32_0 = arith.constant 0 : i32
    return %arg0, %c0_i32, %arg1 : i32, i32, i32
  }
  func.func @transform_3(%arg0: i32, %arg1: i32, %arg2: i32) -> (i32, i32, i32) {
    %c0_i32 = arith.constant 0 : i32
    return %arg0, %arg2, %arg1 : i32, i32, i32
  }
}

</mosaic_0001>

<bundles_post_ra>
// kernel: tpu_custom_call.1
= control target key start
LH: loop header
LB: loop body
LE: loop exit
PB: predicated region body
PF: predicated region fallthrough
CT: control target
= control target key end

     0   :  { %8 = vsyncpa [#allocation3], 0  ;;  %s1073_s0 = inlined_call_operand.hbm [shape: bf16[2,8,32], index: 0, kind: input, shape index: {}]   ;;  %s1074_s1 = inlined_call_operand.hbm [shape: bf16[2,16,32], index: 1, kind: input, shape index: {}]   ;;  %s1075_s2 = inlined_call_operand.vmem [shape: s32[2,1,16], index: 2, kind: input, shape index: {}]   ;;  %s1076_s3 = inlined_call_operand.hbm [shape: f32[2,8,16], index: 3, kind: output, shape index: {}]  }
   0x1   :  { %10 = vsyncpa [#allocation3 + $0x1], 0 }
   0x2   :  { %11 = vsyncpa [#allocation6], 0 }
   0x3   :  { %13 = vsyncpa [#allocation6 + $0x1], 0 }
   0x4   :  { %14 = vsyncpa [#allocation4], 0 }
   0x5   :  { %16 = vsyncpa [#allocation4 + $0x1], 0  ;;  %s857_s12 = smov 0   ;;  %s859_s13 = smov 0  }
   0x6   :  { %s861_s14 = smov 0   ;;  %s863_s15 = smov 0  }
   0x7   :  { %s865_s16 = smov 0   ;;  %s867_s17 = smov 0  }
   0x8 LB: > { %s562_s18 = sadd.s32 4294967295, %s827_s17   ;;  %s563_s19 = sadd.s32 4294967294, %s827_s17   ;;  %s827_s17 = sphi %s867_s17, %s22_s17   ;;  %s823_s16 = sphi %s865_s16, %s1092_s16   ;;  %s819_s15 = sphi %s863_s15, %s1091_s15   ;;  %s815_s14 = sphi %s861_s14, %s1090_s14   ;;  %s811_s13 = sphi %s859_s13, %s1089_s13   ;;  %s807_s12 = sphi %s857_s12, %s1088_s12  }
   0x9   : > { %s41_s20 = sadd.s32 1, %s823_s16  ;;  %s50_s21 = sadd.s32 1, %s815_s14 }
   0xa   : > { %p43_p0 = scmp.ge.s32.totalorder %s41_s20, 2  ;;  %p57_p1 = scmp.ne.s32.totalorder %s815_s14, %s811_s13 }
   0xb   : > { %p58_p2 = scmp.eq.s32.totalorder %s827_s17, 0  ;;  %p63_p3 = scmp.ne.s32.totalorder %s811_s13, %s807_s12 }
   0xc   : > { %s1094_s20 = smov (%p43_p0, %s41_s20), 0  ;;  %p64_p5 = scmp.eq.s32.totalorder %s562_s18, 0 }
   0xd   : > { %p898_p4 = por %p58_p2, %p57_p1  ;;  %s45_s23 = ssub.s32 %s823_s16, %s1094_s20 }
   0xe   : > { %p147_p6 = scmp.eq.s32.totalorder %s562_s18, 1  ;;  %p48_p7 = scmp.eq.s32.totalorder %s45_s23, 0 }
   0xf   : > { %p904_p8 = por %p64_p5, %p63_p3  ;;  %p153_p10 = scmp.eq.s32.totalorder %s563_s19, 1 }
  0x10   : > { %p908_p9 = por %p147_p6, %p57_p1  ;;  %p1077_p12 = scmp.ge.s32.totalorder %s827_s17, 2 }
  0x11   : > { %s1081_s24 = scalar_select %p904_p8, 1, 0 }
  0x12   : > { %s1082_s25 = scalar_select %p908_p9, 1, 0 }
  0x13   : > { %s913_s26 = scalar_select %p48_p7, %s815_s14, %s50_s21  }
  0x14   : > { %p915_p11 = por %p153_p10, %p63_p3  ;;  %169 = sbr.rel (%p1077_p12) target bundleno = 78 (0x4e), region = 16 }
  0x15   : > { %s923_s28 = sand.u32 (!%p1077_p12), 1, %s815_s14   ;;  %s567_s29 = sshll.u32 (!%p1077_p12), %s823_s16, 6 }
  0x16   : > { %s1083_s27 = scalar_select %p915_p11, 1, 0 }
  0x17   : > { %s566_s30 = sshll.u32 (!%p1077_p12), %s923_s28, 2  ;;  %s930_s6 = scalar_lea.hbm (!%p1077_p12), %s1073_s0, %s567_s29 }
  0x18   : > { %s177_s7 = scalar_lea.vmem (!%p1077_p12), [#allocation2], %s566_s30  ;;  %s174_s9 = scalar_lea.sflag (!%p1077_p12), [#allocation3], %s923_s28 }
  0x19   : > { %s185_s8 = sshll.u32 (!%p1077_p12), %s177_s7, 4  ;;  %s689_s10 = scalar_lea.hbm (!%p1077_p12), %s930_s6, 64  ;;  %s186_s8 = int_to_ptr.vmem [resolvable:$true] %s185_s8 }
  0x1a   : > { %p690_p13 = scmp.ne.s32.totalorder (!%p1077_p12), %s930_s6, %s689_s10  ;;  %s693_s19 = scalar_lea.hbm (!%p1077_p12), %s1073_s0, 128 }
  0x1b   : > { %p694_p2 = scmp.lt.u32.totalorder %s930_s6, %s1073_s0  ;;  %p695_p3 = scmp.lt.u32.totalorder %s693_s19, %s689_s10 }
  0x1c   : > { %p691_p0 = pnand %p690_p13, %p898_p4  ;;  %p697_p6 = scmp.lt.u32.totalorder %s689_s10, %s930_s6 }
  0x1d   : > { %p696_p5 = por %p695_p3, %p694_p2 }
  0x1e   : > { %p692_p1 = pneg %p691_p0 }
  0x1f   : > { %p698_p7 = por %p697_p6, %p696_p5 }
  0x21   : > { %p699_p10 = pnand %p698_p7, %p692_p1 }
  0x23   : > { %702 = shalt.err (!%p699_p10)
}
  0x24   : > { %s703_s29 = scalar_lea.vmem %s186_s8, 64  ;;  %s829_s30 = smov [#allocation2]  }
  0x25   : > { %p704_p12 = scmp.ne.s32.totalorder %s186_s8, %s703_s29  ;;  %s707_s4 = sshll.u32 %s829_s30, 4  ;;  %s708_s4 = int_to_ptr.vmem [resolvable:$false] %s707_s4 }
  0x26   : > { %s709_s5 = scalar_lea.vmem %s708_s4, 128  ;;  %p710_p11 = scmp.lt.s32.totalorder %s186_s8, %s708_s4 }
  0x27   : > { %p705_p13 = pnand %p704_p12, %p898_p4  ;;  %p711_p9 = scmp.lt.s32.totalorder %s709_s5, %s703_s29 }
  0x29   : > { %p706_p0 = pneg %p705_p13  ;;  %p712_p8 = por %p711_p9, %p710_p11 }
  0x2b   : > { %p713_p2 = pnand %p712_p8, %p706_p0 }
  0x2d   : > { %716 = shalt.err (!%p713_p2)
}
  0x2e   : > { %618 = dma.hbm_to_vmem [thread:$0]  (%p898_p4), %s930_s6, 64, %s186_s8, %s174_s9  }
  0x2f   : > { %191 = sbr.rel (!%p898_p4) target bundleno = 78 (0x4e), region = 24  ;;  %s568_s7 = sshll.u32 (%p898_p4), %s923_s28, 6 }
  0x30   : > { %s193_s10 = scalar_lea.sflag (%p898_p4), [#allocation6], %s923_s28  ;;  %s196_s11 = scalar_lea.vmem (%p898_p4), [#allocation5], %s568_s7 }
  0x36   : > { %202 = vsyncadd %s193_s10, 896  ;;  %s588_s18 = sshll.u32 %s823_s16, 7  ;;  %s209_s19 = sshll.u32 %s196_s11, 4  ;;  %s210_s19 = int_to_ptr.vmem [resolvable:$true] %s209_s19 }
  0x37   : > { %s960_s29 = scalar_lea.hbm %s1074_s1, %s588_s18  ;;  %s719_s9 = scalar_lea.hbm %s1074_s1, 256 }
  0x38   : > { %s717_s22 = scalar_lea.hbm %s960_s29, 128  ;;  %p720_p8 = scmp.lt.u32.totalorder %s960_s29, %s1074_s1 }
  0x39   : > { %p718_p4 = scmp.ne.s32.totalorder %s960_s29, %s717_s22  ;;  %p721_p9 = scmp.lt.u32.totalorder %s719_s9, %s717_s22 }
  0x3a   : > { %p723_p12 = scmp.lt.u32.totalorder %s717_s22, %s960_s29 }
  0x3b   : > { %p722_p11 = por %p721_p9, %p720_p8 }
  0x3d   : > { %p724_p1 = por %p723_p12, %p722_p11 }
  0x3f   : > { %p725_p3 = pnand %p724_p1, %p718_p4 }
  0x41   : > { %728 = shalt.err (!%p725_p3)
}
  0x42   : > { %s729_s5 = scalar_lea.vmem %s210_s19, 128  ;;  %s830_s7 = smov [#allocation5]  }
  0x43   : > { %p730_p5 = scmp.ne.s32.totalorder %s210_s19, %s729_s5  ;;  %s731_s11 = sshll.u32 %s830_s7, 4  ;;  %s732_s11 = int_to_ptr.vmem [resolvable:$false] %s731_s11 }
  0x44   : > { %s733_s18 = scalar_lea.vmem %s732_s11, 2048  ;;  %p734_p6 = scmp.lt.s32.totalorder %s210_s19, %s732_s11 }
  0x45   : > { %p735_p7 = scmp.lt.s32.totalorder %s733_s18, %s729_s5 }
  0x47   : > { %p736_p10 = por %p735_p7, %p734_p6 }
  0x49   : > { %p737_p13 = pnand %p736_p10, %p730_p5 }
  0x4b   : > { %740 = shalt.err (!%p737_p13)
}
  0x4c   : > { %s831_s21 = smov 64   ;;  %s832_s23 = smov 4  }
  0x4d   : > { %215 = dma.hbm_to_vmem [thread:$0]  %s960_s29, 128, %s210_s19, %s193_s10, %s831_s21, %s831_s21, %s832_s23  }
  0x4e PF: > { %p571_p0 = scmp.ge.s32.totalorder %s827_s17, 1  ;;  %p226_p2 = scmp.lt.s32.totalorder %s827_s17, 3 }
  0x50   : > { %p227_p4 = pnand %p571_p0, %p226_p2 }
  0x51   : > { %s978_s22 = sand.u32 (!%p227_p4), 1, %s811_s13   ;;  %p1084_p8 = scmp.ne.s32.totalorder (!%p227_p4), %s1081_s24, 0 }
  0x52   : > { %230 = sbr.rel (%p227_p4) target bundleno = 386 (0x182), region = 32  ;;  %s572_s6 = sshll.u32 (!%p227_p4), %s978_s22, 2 }
  0x53   : > { %s233_s8 = scalar_lea.sflag (!%p227_p4), [#allocation3], %s978_s22  ;;  %s982_s9 = scalar_lea.vmem (!%p227_p4), [#allocation2], %s572_s6 }
  0x59   : > { %794 = dma.done.wait (%p1084_p8), %s233_s8, 64  }
  0x5a   : > { %796 = vsyncadd (%p1084_p8), %s233_s8, 4294967232  ;;  %s573_s28 = sshll.u32 %s978_s22, 6  ;;  %s242_s10 = scalar_lea.sflag [#allocation6], %s978_s22 }
  0x5b   : > { %s990_s19 = scalar_lea.vmem [#allocation5], %s573_s28 }
  0x5c   : > { %798 = dma.done.wait (%p1084_p8), %s242_s10, 1024  }
  0x5d   : > { %800 = vsyncadd (%p1084_p8), %s242_s10, 4294966272  ;;  %v833_v0 = vmov 0.0   ;;  %vm834_vm0 = vmmov 0   ;;  %vm346_vm1 = vcmask 261120   ;;  %v681_v1 = vld [vmem:[%s990_s19] sm:$0xff]   ;;  %v682_v3 = vld [vmem:[%s990_s19 + $0x8] sm:$0xff]   ;;  %v417_v18 = vlaneseq }
  0x5e   : > { %598 = vmatprep.subr.bf16.mxu0 %v833_v0  ;;  %614 = vmatprep.mubr.msk.bf16.mxu0 %vm834_vm0, %v833_v0  ;;  %v351_v2 = vsel %vm346_vm1, %v681_v1, 0  ;;  %v354_v4 = vsel %vm346_vm1, %v682_v3, 0  ;;  %v683_v5 = vld [vmem:[%s990_s19 + $0x10] sm:$0xff]   ;;  %v684_v7 = vld [vmem:[%s990_s19 + $0x18] sm:$0xff]   ;;  %v685_v9 = vld [vmem:[%s990_s19 + $0x20] sm:$0xff]   ;;  %p282_p9 = scmp.lt.s32.totalorder %s819_s15, 1 }
  0x5f   : > { %599 = vmatpush3.bf16.xpose.msra.mxu0 %v351_v2  ;;  %v357_v6 = vsel %vm346_vm1, %v683_v5, 0  ;;  %v360_v8 = vsel %vm346_vm1, %v684_v7, 0  ;;  %v363_v10 = vsel %vm346_vm1, %v685_v9, 0  ;;  %v686_v11 = vld [vmem:[%s990_s19 + $0x28] sm:$0xff]   ;;  %v687_v13 = vld [vmem:[%s990_s19 + $0x30] sm:$0xff]   ;;  %v688_v15 = vld [vmem:[%s990_s19 + $0x38] sm:$0xff]  }
  0x60   : > { %600 = vmatprep.subr.bf16.mxu0 %v833_v0  ;;  %v366_v12 = vsel %vm346_vm1, %v686_v11, 0  ;;  %v369_v14 = vsel %vm346_vm1, %v687_v13, 0  ;;  %v372_v16 = vsel %vm346_vm1, %v688_v15, 0  ;;  %v289_v17 = vld [vmem:[%s982_s9] sm:$0xf]  ;;  %s283_s24 = scalar_select %p282_p9, %s819_s15, 1 }
  0x61   : > { %v418_v20 = vshrl.u32 %v417_v18, 7  ;;  %s574_s5 = sshll.u32 %s978_s22, 3  ;;  %v835_v22 = vmov 0   ;;  %s585_s7 = sshll.u32 %s819_s15, 7 }
  0x62   : > { %s287_s4 = scalar_lea.vmem %s1075_s2, %s283_s24  ;;  %s278_s11 = scalar_lea.vmem [#allocation7], %s574_s5 }
  0x63   : > { %v414_v19 = vld [vmem:[%s287_s4] sm:$0x1]  ;;  %v419_v21 = vsub.s32 0, %v418_v20  ;;  %s440_s18 = sshll.u32 %s278_s11, 4  ;;  %s1024_s6 = scalar_lea.hbm %s1076_s3, %s585_s7  ;;  %s1026_s18 = int_to_ptr.vmem [resolvable:$true] %s440_s18 }
  0x64   : > { %vm415_vm2 = vcmp.ne.s32.totalorder %v414_v19, 0  ;;  %s425_s15 = scalar_lea.sflag [#allocation4], %s978_s22  ;;  %s741_s8 = scalar_lea.vmem %s1026_s18, 128 }
  0x65   : > { %v416_v23 = vsel %vm415_vm2, 1, %v835_v22  ;;  %p742_p11 = scmp.ne.s32.totalorder %s1026_s18, %s741_s8  ;;  %p1085_p12 = scmp.ne.s32.totalorder %s1082_s25, 0 }
  0x66   : > { %v420_v24 = vrot.slane %v416_v23, %v419_v21  ;;  %s836_s9 = smov [#allocation7]  }
  0x67   : > { %601 = vmatpush3.bf16.xpose.msra.mxu0 %v354_v4  ;;  %p743_p1 = pnand %p742_p11, %p1085_p12  ;;  %s745_s28 = sshll.u32 %s836_s9, 4  ;;  %s746_s28 = int_to_ptr.vmem [resolvable:$false] %s745_s28 }
  0x68   : > { %602 = vmatprep.subr.bf16.mxu0 %v833_v0  ;;  %vm421_vm3 = vcmp.eq.s32.totalorder %v420_v24, 1  ;;  %s747_s10 = scalar_lea.vmem %s746_s28, 256  ;;  %p748_p5 = scmp.lt.s32.totalorder %s1026_s18, %s746_s28 }
  0x69   : > { %p744_p3 = pneg %p743_p1  ;;  %p749_p6 = scmp.lt.s32.totalorder %s747_s10, %s741_s8 }
  0x6b   : > { %p750_p7 = por %p749_p6, %p748_p5 }
  0x6d   : > { %p751_p10 = pnand %p750_p7, %p744_p3 }
  0x6f   : > { %603 = vmatpush3.bf16.xpose.msra.mxu0 %v357_v6 }
  0x70   : > { %604 = vmatprep.subr.bf16.mxu0 %v833_v0 }
  0x77   : > { %605 = vmatpush3.bf16.xpose.msra.mxu0 %v360_v8 }
  0x78   : > { %606 = vmatprep.subr.bf16.mxu0 %v833_v0 }
  0x7f   : > { %607 = vmatpush3.bf16.xpose.msra.mxu0 %v363_v10 }
  0x80   : > { %608 = vmatprep.subr.bf16.mxu0 %v833_v0 }
  0x87   : > { %609 = vmatpush3.bf16.xpose.msra.mxu0 %v366_v12 }
  0x88   : > { %610 = vmatprep.subr.bf16.mxu0 %v833_v0 }
  0x8f   : > { %611 = vmatpush3.bf16.xpose.msra.mxu0 %v369_v14 }
  0x90   : > { %612 = vmatprep.subr.bf16.mxu0 %v833_v0 }
  0x97   : > { %613 = vmatpush3.bf16.xpose.msra.mxu0 %v372_v16 }
  0x9e   : > { %615 = vmatmul.mubr.msk.bf16.vlgmr.msra.gmra.mrb[0].mxu0 %vm346_vm1, %v289_v17 }
 0x171   : > { %v408_v25 = vpop.f32.mrb[0].mxu0 }
 0x172   : > { %v422_v26 = vsel %vm421_vm3, %v408_v25, -3.4028235e+38  ;;  %v616_v27 = vpop.f32.mrb[1].mxu0 }
 0x173   : > { %423 = vst [vmem:[%s278_s11] sm:$0xff] %v422_v26  ;;  %v411_v28 = vpop.f32.mrb[2].mxu0 }
 0x174   : > { %v617_v29 = vpop.f32.mrb[3].mxu0 }
 0x175   : > { %754 = shalt.err (!%p751_p10)
}
 0x176   : > { %s755_s22 = scalar_lea.hbm %s1024_s6, 128  ;;  %s759_s29 = scalar_lea.hbm %s1076_s3, 256 }
 0x177   : > { %p756_p13 = scmp.ne.s32.totalorder %s1024_s6, %s755_s22  ;;  %p760_p4 = scmp.lt.u32.totalorder %s1024_s6, %s1076_s3 }
 0x178   : > { %p761_p8 = scmp.lt.u32.totalorder %s759_s29, %s755_s22  ;;  %p763_p11 = scmp.lt.u32.totalorder %s755_s22, %s1024_s6 }
 0x179   : > { %p757_p0 = pnand %p756_p13, %p1085_p12 }
 0x17a   : > { %p762_p9 = por %p761_p8, %p760_p4 }
 0x17b   : > { %p758_p2 = pneg %p757_p0 }
 0x17c   : > { %p764_p1 = por %p763_p11, %p762_p9 }
 0x17e   : > { %p765_p3 = pnand %p764_p1, %p758_p2 }
 0x180   : > { %768 = shalt.err (!%p765_p3)
}
 0x181   : > { %621 = dma.vmem_to_hbm [thread:$0]  (%p1085_p12), %s1026_s18, 128, %s1024_s6, %s425_s15  }
 0x182 PF: > { %s452_s5 = sand.u32 1, %s807_s12   ;;  %p1086_p5 = scmp.ne.s32.totalorder %s1083_s27, 0 }
 0x183   : > { %p1087_p6 = scmp.ge.s32.totalorder %s827_s17, 2  ;;  %s453_s7 = scalar_lea.sflag [#allocation4], %s452_s5 }
 0x185   : > { %p624_p7 = pnand %p1087_p6, %p1086_p5 }
 0x187   : > { %802 = dma.done.wait (!%p624_p7), %s453_s7, 128  }
 0x188   : > { %804 = vsyncadd (!%p624_p7), %s453_s7, 4294967168  ;;  %s22_s17 = sadd.s32 1, %s827_s17   ;;  %s1088_s12 = smov %s811_s13 }
 0x189   : > { %p19_p10 = scmp.ge.s32.totalorder %s22_s17, 4   ;;  %s1089_s13 = smov %s815_s14 }
 0x18a   : > { %s1090_s14 = smov %s913_s26  ;;  %s1091_s15 = smov %s823_s16 }
 0x18b   : > { %s1092_s16 = smov %s1094_s20  ;;  %21 = sbr.rel (!%p19_p10) target bundleno = 8 (0x8), region = 93 }
 0x192   :  { %458 = vsyncpa [#allocation3], 1 }
 0x193   :  { %460 = vsyncpa [#allocation3 + $0x1], 1 }
 0x194   :  { %461 = vsyncpa [#allocation6], 1 }
 0x195   :  { %463 = vsyncpa [#allocation6 + $0x1], 1 }
 0x196   :  { %464 = vsyncpa [#allocation4], 1 }
 0x197   :  { %466 = vsyncpa [#allocation4 + $0x1], 1 }

</bundles_post_ra>
